<compile_context>
chip_gen: v6e
topology: v6e:2x2x1
jax: 0.10.0
libtpu: 0.0.40
codegen_flags: <defaults>
</compile_context>

<pallas_src>
import jax
import jax.numpy as jnp
from jax.experimental import pallas as pl
from jax.experimental.pallas import tpu as pltpu

PREDICTIONS_KEY = "predictions"


def _round_up(x, m):
    return ((x + m - 1) // m) * m


def _ensemble_kernel(x_ref, w_ref, b_ref, o_ref):
    """One batch tile: out = x @ mean_r(W_r) + mean_r(b_r) (means precomputed)."""
    y = jnp.dot(x_ref[...], w_ref[...], preferred_element_type=jnp.float32)
    o_ref[...] = (y + b_ref[...]).astype(o_ref.dtype)  # bias add in f32


def dl_ensemble_forward(x, w_stack, b_stack, *,
                        compute_dtype=jnp.float32, tile_b=512):
    """Ensembled forward pass; returns {"predictions": mean over clones}.

    x:        (B, D)      input batch
    w_stack:  (R, D, H)   per-clone Linear weights
    b_stack:  (R, H)      per-clone Linear biases
    """
    B, D = x.shape
    R, D2, H = w_stack.shape
    assert D == D2 and b_stack.shape == (R, H)
    out_dtype = x.dtype

    # Linearity fold, hoisted OUT of the kernel:
    #   mean_r(x @ W_r + b_r) == x @ mean_r(W_r) + mean_r(b_r)
    # Done once here instead of once per grid step (cuts per-step vector loads
    # ~R x, resident weight VMEM R x, weight HBM DMA R x).
    w_mean = jnp.mean(w_stack, axis=0)            # (D, H)  f32
    b_mean = jnp.mean(b_stack, axis=0)[None, :]   # (1, H)  f32 (stays f32)

    # Lane-dense output: pad the prediction dim up to a multiple of 128 so the
    # output store is an unmasked full-lane vst; pad sliced off after.
    # TODO(synk): on v5e (lower HBM BW) with H << 128 and very large B, the 4x
    # padded f32 output write + post-slice may outweigh the masked-store
    # penalty it avoids — benchmark an unpadded-H out_spec at deployment B.
    h_pad = max(128, _round_up(H, 128))
    if h_pad != H:
        w_mean = jnp.pad(w_mean, ((0, 0), (0, h_pad - H)))
        b_mean = jnp.pad(b_mean, ((0, 0), (0, h_pad - H)))

    # bf16 opt-in: cast the streamed operands ONCE in the wrapper (halves the
    # x read stream and weight DMA); f32 accumulate inside the kernel.
    if x.dtype != compute_dtype:
        x = x.astype(compute_dtype)
    if w_mean.dtype != compute_dtype:
        w_mean = w_mean.astype(compute_dtype)

    # Batch tiling: single "parallel" grid axis over batch tiles.
    #  - small batch: one sublane-aligned tile, single grid step.
    #  - large batch: tiles up to tile_b, but capped so there are >= 2 grid
    #    steps (lets v7x shard the axis across its 2 TensorCores).
    b8 = _round_up(B, 8)
    if b8 <= 256:
        tb = b8
    else:
        tb = min(tile_b, _round_up((b8 + 1) // 2, 256))
    b_padded = _round_up(b8, tb)
    if b_padded != B:
        x = jnp.pad(x, ((0, b_padded - B), (0, 0)))

    cost = pl.CostEstimate(
        flops=2 * b_padded * D * h_pad,
        transcendentals=0,
        bytes_accessed=(x.size * jnp.dtype(x.dtype).itemsize
                        + w_mean.size * jnp.dtype(w_mean.dtype).itemsize
                        + b_mean.size * jnp.dtype(b_mean.dtype).itemsize
                        + b_padded * h_pad * jnp.dtype(out_dtype).itemsize),
    )

    out_padded = pl.pallas_call(
        _ensemble_kernel,
        out_shape=jax.ShapeDtypeStruct((b_padded, h_pad), out_dtype),
        grid=(b_padded // tb,),
        in_specs=[
            # x: one batch tile per grid step.
            pl.BlockSpec((tb, D), lambda i: (i, 0)),
            # mean-W / mean-b: same block every step -> fetched once, resident.
            # TODO(synk): if D*h_pad ever grows to MiB scale, pin these
            # constant-index blocks to a single pipeline buffer
            # (pipeline_mode=pl.Buffered(1)) to halve their VMEM footprint
            # (matters first on v7x's 64 MiB VMEM).
            pl.BlockSpec((D, h_pad), lambda i: (0, 0)),
            pl.BlockSpec((1, h_pad), lambda i: (0, 0)),
        ],
        out_specs=pl.BlockSpec((tb, h_pad), lambda i: (i, 0)),
        compiler_params=pltpu.CompilerParams(
            dimension_semantics=("parallel",)),
        cost_estimate=cost,
    )(x, w_mean, b_mean)

    return {PREDICTIONS_KEY: out_padded[:B, :H]}


def _reference(x, w_stack, b_stack):
    # Pure-JAX reference matching torch.stack([m(x) for m in ms]).mean(0).
    ys = jnp.einsum("bd,rdh->rbh", x, w_stack) + b_stack[:, None, :]
    return {PREDICTIONS_KEY: jnp.mean(ys, axis=0)}


if __name__ == "__main__":
    # Small shapes consistent with the module: batch=8, features=32,
    # prediction dim=32, num_repeat=4 ensemble members.
    B, D, H, R = 8, 32, 32, 4

    key = jax.random.PRNGKey(0)
    kx, kw, kb = jax.random.split(key, 3)

    x = jax.random.normal(kx, (B, D), dtype=jnp.float32)
    # Deterministic, distinct weights per clone (synthetic init, no checkpoint).
    w_stack = jax.random.normal(kw, (R, D, H), dtype=jnp.float32) * 0.1
    b_stack = jax.random.normal(kb, (R, H), dtype=jnp.float32) * 0.01

    ref = _reference(x, w_stack, b_stack)

    # f32 matmul path.
    out = dl_ensemble_forward(x, w_stack, b_stack)
    jax.block_until_ready(out[PREDICTIONS_KEY])
    assert out[PREDICTIONS_KEY].shape == (B, H)
    assert jnp.allclose(out[PREDICTIONS_KEY], ref[PREDICTIONS_KEY],
                        atol=1e-5, rtol=1e-5)

    # bf16-input matmul path (full v6e/v7x MXU rate, f32 accumulate).
    out_bf16 = dl_ensemble_forward(x, w_stack, b_stack,
                                   compute_dtype=jnp.bfloat16)
    jax.block_until_ready(out_bf16[PREDICTIONS_KEY])
    assert jnp.allclose(out_bf16[PREDICTIONS_KEY], ref[PREDICTIONS_KEY],
                        atol=3e-2, rtol=3e-2)

    # Larger batch exercising the multi-step "parallel" grid + batch padding.
    B2 = 600
    x2 = jax.random.normal(kx, (B2, D), dtype=jnp.float32)
    ref2 = _reference(x2, w_stack, b_stack)
    out2 = dl_ensemble_forward(x2, w_stack, b_stack)
    jax.block_until_ready(out2[PREDICTIONS_KEY])
    assert out2[PREDICTIONS_KEY].shape == (B2, H)
    assert jnp.allclose(out2[PREDICTIONS_KEY], ref2[PREDICTIONS_KEY],
                        atol=1e-5, rtol=1e-5)

    # TODO(synk): custom `ensemble_fn` overrides and IDLModel.postprocess have
    # no fixed semantics here; only the default stack-mean ensemble over a
    # linear head is implemented (the fold mean_r(x@W_r+b_r) ==
    # x@mean_r(W_r)+mean_r(b_r) would not hold for a nonlinear base model —
    # that case would need per-clone forwards again).
    print("KERNEL_OK")
</pallas_src>

<mosaic_0001>
module attributes {stable_mosaic.version = 11 : i64} {
  func.func @_ensemble_kernel(%arg0: i32, %arg1: memref<8x32xf32, #tpu.memory_space<vmem>>, %arg2: memref<32x128xf32, #tpu.memory_space<vmem>>, %arg3: memref<1x128xf32, #tpu.memory_space<vmem>>, %arg4: memref<8x128xf32, #tpu.memory_space<vmem>>) attributes {dimension_semantics = [#tpu.dimension_semantics<parallel>], iteration_bounds = array<i64: 1>, scalar_prefetch = 0 : i64, scratch_operands = 0 : i64, tpu.core_type = #tpu.core_type<tc>, window_params = [{transform_indices = @transform_0, window_bounds = array<i64: 8, 32>}, {pipeline_mode = #tpu.pipeline_mode<synchronous>, transform_indices = @transform_1, window_bounds = array<i64: 32, 128>}, {pipeline_mode = #tpu.pipeline_mode<synchronous>, transform_indices = @transform_2, window_bounds = array<i64: 1, 128>}, {transform_indices = @transform_3, window_bounds = array<i64: 8, 128>}]} {
    %c0 = arith.constant 0 : index
    %c0_0 = arith.constant 0 : index
    %0 = vector.load %arg1[%c0, %c0_0] : memref<8x32xf32, #tpu.memory_space<vmem>>, vector<8x32xf32>
    %c0_1 = arith.constant 0 : index
    %c0_2 = arith.constant 0 : index
    %1 = vector.load %arg2[%c0_1, %c0_2] : memref<32x128xf32, #tpu.memory_space<vmem>>, vector<32x128xf32>
    %cst = arith.constant dense<0.000000e+00> : vector<8x128xf32>
    %2 = tpu.matmul %0, %1, %cst {dimension_numbers = #tpu.dot_dimension_numbers<[1], [0], [0], [1], [0, 0, 1, 1], [], []>} : vector<8x32xf32>, vector<32x128xf32>, vector<8x128xf32> -> vector<8x128xf32>
    %c0_3 = arith.constant 0 : index
    %c0_4 = arith.constant 0 : index
    %3 = vector.load %arg3[%c0_3, %c0_4] : memref<1x128xf32, #tpu.memory_space<vmem>>, vector<1x128xf32>
    %4 = vector.broadcast %3 : vector<1x128xf32> to vector<8x128xf32>
    %5 = arith.addf %2, %4 : vector<8x128xf32>
    %c0_5 = arith.constant 0 : index
    %c0_6 = arith.constant 0 : index
    %6 = vector.load %arg4[%c0_5, %c0_6] : memref<8x128xf32, #tpu.memory_space<vmem>>, vector<8x128xf32>
    tpu.vector_store %arg4[%c0_5, %c0_6], %5 {strides = array<i32>} : memref<8x128xf32, #tpu.memory_space<vmem>>, vector<8x128xf32>,
    return
  }
  func.func @transform_0(%arg0: i32) -> (i32, i32) {
    %c0_i32 = arith.constant 0 : i32
    %c0_i32_0 = arith.constant 0 : i32
    return %arg0, %c0_i32 : i32, i32
  }
  func.func @transform_1(%arg0: i32) -> (i32, i32) {
    %c0_i32 = arith.constant 0 : i32
    %c0_i32_0 = arith.constant 0 : i32
    %c0_i32_1 = arith.constant 0 : i32
    return %c0_i32, %c0_i32_0 : i32, i32
  }
  func.func @transform_2(%arg0: i32) -> (i32, i32) {
    %c0_i32 = arith.constant 0 : i32
    %c0_i32_0 = arith.constant 0 : i32
    %c0_i32_1 = arith.constant 0 : i32
    return %c0_i32, %c0_i32_0 : i32, i32
  }
  func.func @transform_3(%arg0: i32) -> (i32, i32) {
    %c0_i32 = arith.constant 0 : i32
    %c0_i32_0 = arith.constant 0 : i32
    return %arg0, %c0_i32 : i32, i32
  }
}

</mosaic_0001>

<bundles_post_ra>
// kernel: tpu_custom_call.1
= control target key start
LH: loop header
LB: loop body
LE: loop exit
PB: predicated region body
PF: predicated region fallthrough
CT: control target
= control target key end

     0   :  { %8 = vsyncpa [#allocation3], 0  ;;  %s274_s0 = inlined_call_operand.hbm [shape: f32[8,32], index: 0, kind: input, shape index: {}]   ;;  %s275_s1 = inlined_call_operand.hbm [shape: f32[32,128], index: 1, kind: input, shape index: {}]   ;;  %s276_s2 = inlined_call_operand.vmem [shape: f32[1,128], index: 2, kind: input, shape index: {}]   ;;  %s277_s3 = inlined_call_operand.hbm [shape: f32[8,128], index: 3, kind: output, shape index: {}]  }
   0x1   :  { %9 = vsyncpa [#allocation6], 0 }
   0x2   :  { %10 = vsyncpa [#allocation4], 0  ;;  %s235_s12 = smov [#allocation2]   ;;  %s236_s14 = smov [#allocation5]  }
   0x3   :  { %s17_s13 = sshll.u32 %s235_s12, 4  ;;  %s26_s15 = sshll.u32 %s236_s14, 4  ;;  %s18_s13 = int_to_ptr.vmem [resolvable:$true] %s17_s13  ;;  %s27_s15 = int_to_ptr.vmem [resolvable:$true] %s26_s15 }
   0x4   :  { %s177_s16 = scalar_lea.vmem %s18_s13, 128  ;;  %p182_p1 = scmp.lt.s32.totalorder %s18_s13, %s18_s13 }
   0x5   :  { %p178_p0 = scmp.ne.s32.totalorder %s18_s13, %s177_s16  ;;  %p183_p2 = scmp.lt.s32.totalorder %s177_s16, %s177_s16 }
   0x7   :  { %p184_p3 = por %p183_p2, %p182_p1 }
   0x9   :  { %p185_p4 = pnand %p184_p3, %p178_p0 }
   0xb   :  { %188 = shalt.err (!%p185_p4)
}
   0xc   :  { %20 = dma.hbm_to_vmem [thread:$0]  %s274_s0, 128, %s18_s13, [#allocation3]  }
   0xd   :  { %s197_s19 = scalar_lea.vmem %s27_s15, 512  ;;  %p202_p6 = scmp.lt.s32.totalorder %s27_s15, %s27_s15 }
   0xe   :  { %p198_p5 = scmp.ne.s32.totalorder %s27_s15, %s197_s19  ;;  %p203_p7 = scmp.lt.s32.totalorder %s197_s19, %s197_s19 }
  0x10   :  { %p204_p8 = por %p203_p7, %p202_p6 }
  0x12   :  { %p205_p9 = pnand %p204_p8, %p198_p5 }
  0x14   :  { %208 = shalt.err (!%p205_p9)
}
  0x15   :  { %s237_s20 = smov 128   ;;  %s238_s21 = smov 8  }
  0x16   :  { %32 = dma.hbm_to_vmem [thread:$0]  %s275_s1, 512, %s27_s15, [#allocation6], %s237_s20, %s237_s20, %s238_s21  }
  0x17   :  { %229 = dma.done.wait [#allocation3], 128  }
  0x18   :  { %230 = vsyncadd [#allocation3], 4294967168 }
  0x19   :  { %231 = dma.done.wait [#allocation6], 512  }
  0x1a   :  { %232 = vsyncadd [#allocation6], 4294966784  ;;  %v239_v0 = vmov 0.0   ;;  %vm240_vm0 = vmmov 0   ;;  %v45_v1 = vld [vmem:[#allocation5 + $0x18] sm:$0xff]  ;;  %v44_v2 = vld [vmem:[#allocation5 + $0x10] sm:$0xff] }
  0x1b   :  { %151 = vmatprep.subr.mxu0 %v239_v0  ;;  %159 = vmatprep.mubr.msk.f32.mxu0 %vm240_vm0, %v239_v0  ;;  %v43_v3 = vld [vmem:[#allocation5 + $0x8] sm:$0xff]  ;;  %v42_v4 = vld [vmem:[#allocation5] sm:$0xff]  ;;  %v41_v5 = vld [vmem:[#allocation2] sm:$0xff]  ;;  %vm53_vm1 = vcmask 261120   ;;  %s241_s24 = smov [#allocation7]  }
  0x1c   :  { %152 = vmatpush3.msra.mxu0 %v45_v1  ;;  %v144_v6 = vld [vmem:[%s276_s2] ss:$0 sm:$0xff]  ;;  %s134_s25 = sshll.u32 %s241_s24, 4  ;;  %s135_s25 = int_to_ptr.vmem [resolvable:$true] %s134_s25 }
  0x1d   :  { %153 = vmatprep.subr.mxu0 %v239_v0  ;;  %s209_s26 = scalar_lea.vmem %s135_s25, 128  ;;  %p214_p11 = scmp.lt.s32.totalorder %s135_s25, %s135_s25 }
  0x1e   :  { %154 = vmatpush3.msra.mxu0 %v44_v2  ;;  %p210_p10 = scmp.ne.s32.totalorder %s135_s25, %s209_s26  ;;  %p215_p12 = scmp.lt.s32.totalorder %s209_s26, %s209_s26 }
  0x1f   :  { %155 = vmatprep.subr.mxu0 %v239_v0 }
  0x20   :  { %156 = vmatpush3.msra.mxu0 %v43_v3  ;;  %p216_p13 = por %p215_p12, %p214_p11 }
  0x21   :  { %157 = vmatprep.subr.mxu0 %v239_v0 }
  0x22   :  { %158 = vmatpush3.msra.mxu0 %v42_v4  ;;  %p217_p0 = pnand %p216_p13, %p210_p10 }
  0x23   :  { %160 = vmatmul.mubr.msk.f32.vlgmr.msra.gmra.mxu0 %vm53_vm1, %v41_v5 }
  0xe3   :  { %v123_v7 = vpop.f32.mrf.mxu0 }
  0xe4   :  { %v124_v8 = vadd.f32 %v144_v6, %v123_v7 }
  0xe5   :  { %v161_v9 = vpop.f32.mrf.mxu0 }
  0xe6   :  { %127 = vst [vmem:[#allocation7] sm:$0xff] %v124_v8 }
  0xe7   :  { %220 = shalt.err (!%p217_p0)
}
  0xe8   :  { %137 = dma.vmem_to_hbm [thread:$0]  %s135_s25, 128, %s277_s3, [#allocation4]  }
  0xe9   :  { %233 = dma.done.wait [#allocation4], 128  }
  0xea   :  { %234 = vsyncadd [#allocation4], 4294967168 }
  0xeb   :  { %141 = vsyncpa [#allocation3], 1 }
  0xec   :  { %142 = vsyncpa [#allocation6], 1 }
  0xed   :  { %143 = vsyncpa [#allocation4], 1 }

</bundles_post_ra>
